<compile_context>
chip_gen: v5e
topology: v5e:2x2
jax: 0.10.0
libtpu: 0.0.40
codegen_flags: <defaults>
</compile_context>

<pallas_src>
import functools

import jax
import jax.numpy as jnp
from jax import lax
from jax.experimental import pallas as pl
from jax.experimental.pallas import tpu as pltpu


def _mlp_kernel(x_ref, w1_ref, b1_ref, w2_ref, b2_ref, w3_ref, b3_ref, o_ref):
    # Layouts (batch on the lane axis for all activations):
    #   x : (TB, D)   w1: (H, D)   b1: (H, 1)
    #                 w2: (H, H)   b2: (H, 1)
    #                 w3: (1, H)   b3: SMEM (1, 1) scalar
    #   o : (1, TB)   lane-dense output block
    x = x_ref[...]

    # h1^T = w1 @ x^T, expressed as a contraction on D (A @ B^T form) so the
    # wrapper never materializes x^T in HBM and no VMEM transpose is needed.
    h1 = lax.dot_general(
        w1_ref[...], x,
        dimension_numbers=(((1,), (1,)), ((), ())),
        preferred_element_type=jnp.float32)            # (H, TB)
    h1 = jnp.maximum(h1 + b1_ref[...], 0.0)

    # astype is a no-op for f32 params; for bf16 params it keeps the MXU on
    # the native bf16 path while still accumulating in f32.
    h2 = jnp.dot(w2_ref[...], h1.astype(w2_ref.dtype),
                 preferred_element_type=jnp.float32)   # (H, TB)
    h2 = jnp.maximum(h2 + b2_ref[...], 0.0)

    out = jnp.dot(w3_ref[...], h2.astype(w3_ref.dtype),
                  preferred_element_type=jnp.float32)  # (1, TB), lane-dense
    out = out + b3_ref[0, 0]
    o_ref[...] = out.astype(o_ref.dtype)


@functools.partial(jax.jit, static_argnames=("tb",))
def simple_feed_forward_nn(x, params, *, tb=None):
    """Forward pass of SimpleFeedForwardNN.

    x:      (B, input_dim) float32 (bf16 also supported)
    params: PyTorch nn.Linear layout:
            w1 (H, D), b1 (H,), w2 (H, H), b2 (H,), w3 (1, H), b3 (1,)
    returns (B, 1) scores
    """
    w1, b1 = params["w1"], params["b1"]
    w2, b2 = params["w2"], params["b2"]
    w3, b3 = params["w3"], params["b3"]

    B, D = x.shape
    H = w1.shape[0]

    if tb is None:
        # Big batch tile to amortize per-grid-step overhead (~0.35 us); for
        # large B use a multiple of 128 (lane-dense) with >=2 grid steps so
        # both v7x TensorCores get work via the "parallel" grid axis.
        tb = B if B <= 1024 else 512

    b1c = b1.reshape(H, 1)      # column bias, broadcasts over lanes
    b2c = b2.reshape(H, 1)
    b3s = b3.reshape(1, 1)      # scalar -> SMEM

    grid = (pl.cdiv(B, tb),)

    outT = pl.pallas_call(
        _mlp_kernel,
        out_shape=jax.ShapeDtypeStruct((1, B), x.dtype),
        grid_spec=pltpu.PrefetchScalarGridSpec(
            num_scalar_prefetch=0,
            grid=grid,
            in_specs=[
                pl.BlockSpec((tb, D), lambda i: (i, 0)),   # x batch tile
                pl.BlockSpec((H, D), lambda i: (0, 0)),    # w1 (resident)
                pl.BlockSpec((H, 1), lambda i: (0, 0)),    # b1
                pl.BlockSpec((H, H), lambda i: (0, 0)),    # w2 (resident)
                pl.BlockSpec((H, 1), lambda i: (0, 0)),    # b2
                pl.BlockSpec((1, H), lambda i: (0, 0)),    # w3
                pl.BlockSpec(memory_space=pltpu.MemorySpace.SMEM),  # b3 scalar
            ],
            out_specs=pl.BlockSpec((1, tb), lambda i: (0, i)),  # lane-dense
        ),
        compiler_params=pltpu.CompilerParams(
            dimension_semantics=("parallel",),
        ),
        # NOTE: for very large H on v7x (64 MiB VMEM), put
        # pipeline_mode=pl.Buffered(1) on the constant weight specs and raise
        # vmem_limit_bytes; unnecessary at these sizes.
    )(x, w1, b1c, w2, b2c, w3, b3s)

    return outT.T               # (B, 1)


def init_params(key, input_dim, hidden_dim, dtype=jnp.float32):
    """PyTorch nn.Linear default init: U(-1/sqrt(fan_in), 1/sqrt(fan_in)),
    weights stored in PyTorch (out_features, in_features) layout."""
    ks = jax.random.split(key, 6)

    def uniform(k, shape, fan_in):
        bound = 1.0 / jnp.sqrt(jnp.asarray(fan_in, jnp.float32))
        return jax.random.uniform(k, shape, dtype, minval=-bound, maxval=bound)

    return {
        "w1": uniform(ks[0], (hidden_dim, input_dim), input_dim),
        "b1": uniform(ks[1], (hidden_dim,), input_dim),
        "w2": uniform(ks[2], (hidden_dim, hidden_dim), hidden_dim),
        "b2": uniform(ks[3], (hidden_dim,), hidden_dim),
        "w3": uniform(ks[4], (1, hidden_dim), hidden_dim),
        "b3": uniform(ks[5], (1,), hidden_dim),
    }


def _reference(x, p):
    h1 = jnp.maximum(x @ p["w1"].T + p["b1"], 0.0)
    h2 = jnp.maximum(h1 @ p["w2"].T + p["b2"], 0.0)
    return h2 @ p["w3"].T + p["b3"]


if __name__ == "__main__":
    key = jax.random.PRNGKey(0)
    k_x, k_p, k_x2 = jax.random.split(key, 3)

    batch, input_dim, hidden_dim = 8, 16, 32
    x = jax.random.normal(k_x, (batch, input_dim), dtype=jnp.float32)
    params = init_params(k_p, input_dim, hidden_dim)

    scores = jax.block_until_ready(simple_feed_forward_nn(x, params))
    ref = _reference(x, params)
    assert scores.shape == (batch, 1), scores.shape
    assert jnp.allclose(scores, ref, atol=1e-5, rtol=1e-5), "mismatch (B=8)"

    # Multi-step grid / lane-dense 128-wide tile sanity check.
    x2 = jax.random.normal(k_x2, (256, input_dim), dtype=jnp.float32)
    scores2 = jax.block_until_ready(simple_feed_forward_nn(x2, params, tb=128))
    ref2 = _reference(x2, params)
    assert scores2.shape == (256, 1), scores2.shape
    assert jnp.allclose(scores2, ref2, atol=1e-5, rtol=1e-5), "mismatch (B=256)"

    print("KERNEL_OK")
</pallas_src>

<mosaic_0001>
module attributes {stable_mosaic.version = 11 : i64} {
  func.func @_mlp_kernel(%arg0: i32, %arg1: memref<8x16xf32, #tpu.memory_space<vmem>>, %arg2: memref<32x16xf32, #tpu.memory_space<vmem>>, %arg3: memref<32x1xf32, #tpu.memory_space<vmem>>, %arg4: memref<32x32xf32, #tpu.memory_space<vmem>>, %arg5: memref<32x1xf32, #tpu.memory_space<vmem>>, %arg6: memref<1x32xf32, #tpu.memory_space<vmem>>, %arg7: memref<1x1xf32, #tpu.memory_space<smem>>, %arg8: memref<1x8xf32, #tpu.memory_space<vmem>>) attributes {dimension_semantics = [#tpu.dimension_semantics<parallel>], iteration_bounds = array<i64: 1>, scalar_prefetch = 0 : i64, scratch_operands = 0 : i64, tpu.core_type = #tpu.core_type<tc>, window_params = [{transform_indices = @transform_0, window_bounds = array<i64: 8, 16>}, {pipeline_mode = #tpu.pipeline_mode<synchronous>, transform_indices = @transform_1, window_bounds = array<i64: 32, 16>}, {pipeline_mode = #tpu.pipeline_mode<synchronous>, transform_indices = @transform_2, window_bounds = array<i64: 32, 1>}, {pipeline_mode = #tpu.pipeline_mode<synchronous>, transform_indices = @transform_3, window_bounds = array<i64: 32, 32>}, {pipeline_mode = #tpu.pipeline_mode<synchronous>, transform_indices = @transform_4, window_bounds = array<i64: 32, 1>}, {pipeline_mode = #tpu.pipeline_mode<synchronous>, transform_indices = @transform_5, window_bounds = array<i64: 1, 32>}, {transform_indices = @transform_6, window_bounds = array<i64: 1, 1>}, {transform_indices = @transform_7, window_bounds = array<i64: 1, 8>}]} {
    %c0 = arith.constant 0 : index
    %c0_0 = arith.constant 0 : index
    %0 = vector.load %arg1[%c0, %c0_0] : memref<8x16xf32, #tpu.memory_space<vmem>>, vector<8x16xf32>
    %c0_1 = arith.constant 0 : index
    %c0_2 = arith.constant 0 : index
    %1 = vector.load %arg2[%c0_1, %c0_2] : memref<32x16xf32, #tpu.memory_space<vmem>>, vector<32x16xf32>
    %cst = arith.constant dense<0.000000e+00> : vector<32x8xf32>
    %2 = tpu.matmul %1, %0, %cst {dimension_numbers = #tpu.dot_dimension_numbers<[1], [1], [0], [0], [0, 0, 1, 0], [], []>} : vector<32x16xf32>, vector<8x16xf32>, vector<32x8xf32> -> vector<32x8xf32>
    %c0_3 = arith.constant 0 : index
    %c0_4 = arith.constant 0 : index
    %3 = vector.load %arg3[%c0_3, %c0_4] : memref<32x1xf32, #tpu.memory_space<vmem>>, vector<32x1xf32>
    %4 = vector.broadcast %3 : vector<32x1xf32> to vector<32x8xf32>
    %5 = arith.addf %2, %4 : vector<32x8xf32>
    %cst_5 = arith.constant 0.000000e+00 : f32
    %6 = vector.broadcast %cst_5 : f32 to vector<32x8xf32>
    %7 = arith.maximumf %5, %6 : vector<32x8xf32>
    %c0_6 = arith.constant 0 : index
    %c0_7 = arith.constant 0 : index
    %8 = vector.load %arg4[%c0_6, %c0_7] : memref<32x32xf32, #tpu.memory_space<vmem>>, vector<32x32xf32>
    %cst_8 = arith.constant dense<0.000000e+00> : vector<32x8xf32>
    %9 = tpu.matmul %8, %7, %cst_8 {dimension_numbers = #tpu.dot_dimension_numbers<[1], [0], [0], [1], [0, 0, 1, 1], [], []>} : vector<32x32xf32>, vector<32x8xf32>, vector<32x8xf32> -> vector<32x8xf32>
    %c0_9 = arith.constant 0 : index
    %c0_10 = arith.constant 0 : index
    %10 = vector.load %arg5[%c0_9, %c0_10] : memref<32x1xf32, #tpu.memory_space<vmem>>, vector<32x1xf32>
    %11 = vector.broadcast %10 : vector<32x1xf32> to vector<32x8xf32>
    %12 = arith.addf %9, %11 : vector<32x8xf32>
    %cst_11 = arith.constant 0.000000e+00 : f32
    %13 = vector.broadcast %cst_11 : f32 to vector<32x8xf32>
    %14 = arith.maximumf %12, %13 : vector<32x8xf32>
    %c0_12 = arith.constant 0 : index
    %c0_13 = arith.constant 0 : index
    %15 = vector.load %arg6[%c0_12, %c0_13] : memref<1x32xf32, #tpu.memory_space<vmem>>, vector<1x32xf32>
    %cst_14 = arith.constant dense<0.000000e+00> : vector<1x8xf32>
    %16 = tpu.matmul %15, %14, %cst_14 {dimension_numbers = #tpu.dot_dimension_numbers<[1], [0], [0], [1], [0, 0, 1, 1], [], []>} : vector<1x32xf32>, vector<32x8xf32>, vector<1x8xf32> -> vector<1x8xf32>
    %c0_15 = arith.constant 0 : index
    %c0_16 = arith.constant 0 : index
    %17 = memref.load %arg7[%c0_15, %c0_16] : memref<1x1xf32, #tpu.memory_space<smem>>
    %18 = vector.broadcast %17 : f32 to vector<1x8xf32>
    %19 = arith.addf %16, %18 : vector<1x8xf32>
    %c0_17 = arith.constant 0 : index
    %c0_18 = arith.constant 0 : index
    %20 = vector.load %arg8[%c0_17, %c0_18] : memref<1x8xf32, #tpu.memory_space<vmem>>, vector<1x8xf32>
    tpu.vector_store %arg8[%c0_17, %c0_18], %19 {strides = array<i32>} : memref<1x8xf32, #tpu.memory_space<vmem>>, vector<1x8xf32>,
    return
  }
  func.func @transform_0(%arg0: i32) -> (i32, i32) {
    %c0_i32 = arith.constant 0 : i32
    %c0_i32_0 = arith.constant 0 : i32
    return %arg0, %c0_i32 : i32, i32
  }
  func.func @transform_1(%arg0: i32) -> (i32, i32) {
    %c0_i32 = arith.constant 0 : i32
    %c0_i32_0 = arith.constant 0 : i32
    %c0_i32_1 = arith.constant 0 : i32
    return %c0_i32, %c0_i32_0 : i32, i32
  }
  func.func @transform_2(%arg0: i32) -> (i32, i32) {
    %c0_i32 = arith.constant 0 : i32
    %c0_i32_0 = arith.constant 0 : i32
    %c0_i32_1 = arith.constant 0 : i32
    return %c0_i32, %c0_i32_0 : i32, i32
  }
  func.func @transform_3(%arg0: i32) -> (i32, i32) {
    %c0_i32 = arith.constant 0 : i32
    %c0_i32_0 = arith.constant 0 : i32
    %c0_i32_1 = arith.constant 0 : i32
    return %c0_i32, %c0_i32_0 : i32, i32
  }
  func.func @transform_4(%arg0: i32) -> (i32, i32) {
    %c0_i32 = arith.constant 0 : i32
    %c0_i32_0 = arith.constant 0 : i32
    %c0_i32_1 = arith.constant 0 : i32
    return %c0_i32, %c0_i32_0 : i32, i32
  }
  func.func @transform_5(%arg0: i32) -> (i32, i32) {
    %c0_i32 = arith.constant 0 : i32
    %c0_i32_0 = arith.constant 0 : i32
    %c0_i32_1 = arith.constant 0 : i32
    return %c0_i32, %c0_i32_0 : i32, i32
  }
  func.func @transform_6(%arg0: i32) -> (i32, i32) {
    %c0_i32 = arith.constant 0 : i32
    %c0_i32_0 = arith.constant 0 : i32
    %c0_i32_1 = arith.constant 0 : i32
    return %c0_i32, %c0_i32_0 : i32, i32
  }
  func.func @transform_7(%arg0: i32) -> (i32, i32) {
    %c0_i32 = arith.constant 0 : i32
    %c0_i32_0 = arith.constant 0 : i32
    return %c0_i32, %arg0 : i32, i32
  }
}

</mosaic_0001>

<bundles_post_ra>
// kernel: simple_feed_forward_nn.1
= control target key start
LH: loop header
LB: loop body
LE: loop exit
PB: predicated region body
PF: predicated region fallthrough
CT: control target
= control target key end

     0   :  { %vm57_vm0 = vcmask 130048   ;;  %v274_v3 = vmov 0   ;;  %s387_s0 = inlined_call_operand.vmem [shape: f32[8,16], index: 0, kind: input, shape index: {}]   ;;  %s388_s1 = inlined_call_operand.vmem [shape: f32[32,16], index: 1, kind: input, shape index: {}]   ;;  %s389_s2 = inlined_call_operand.vmem [shape: f32[32,1], index: 2, kind: input, shape index: {}]   ;;  %s390_s3 = inlined_call_operand.vmem [shape: f32[32,32], index: 3, kind: input, shape index: {}]   ;;  %s391_s4 = inlined_call_operand.vmem [shape: f32[32,1], index: 4, kind: input, shape index: {}]   ;;  %s392_s5 = inlined_call_operand.vmem [shape: f32[1,32], index: 5, kind: input, shape index: {}]   ;;  %s393_s6 = inlined_call_operand.<no memory space> [shape: f32[1,1], index: 6, kind: input, shape index: {}]   ;;  %s394_s7 = inlined_call_operand.hbm [shape: f32[1,8], index: 7, kind: output, shape index: {}]  }
   0x1   :  { %v28_v0 = vld [vmem:[%s387_s0] sm:$0xff]  ;;  %v36_v1 = vld [vmem:[%s389_s2 + $0x18] sm:$0xff]  ;;  %246 = vset.pattern.permute.xlu1 %v274_v3  ;;  %v34_v4 = vld [vmem:[%s389_s2 + $0x8] sm:$0xff]  ;;  %245 = vset.pattern.permute.xlu0 %v274_v3 }
   0x2   :  { %224 = vmatpush.xpose.msk.msra.mxu0 %vm57_vm0, %v28_v0  ;;  %v29_v2 = vld [vmem:[%s388_s1] sm:$0xff]  ;;  %44 = vperm.xlu1 %246, %v34_v4   ;;  %v32_v5 = vld [vmem:[%s388_s1 + $0x18] sm:$0xff] }
   0x3   :  { %54 = vperm.xlu0 %245, %v36_v1   ;;  %234 = vmatpush.xpose.msk.msra.mxu1 %vm57_vm0, %v28_v0 }
   0x4   :  { %13 = vsyncpa [#allocation4], 0  ;;  %247 = vset.pattern.permute.xlu2 %v274_v3  ;;  %v33_v6 = vld [vmem:[%s389_s2] sm:$0xff]  ;;  %v35_v7 = vld [vmem:[%s389_s2 + $0x10] sm:$0xff]  ;;  %vm134_vm1 = vcmask 261120   ;;  %v182_v51 = vstv %s393_s6  ;;  %s275_s10 = smov [#allocation3]  }
   0x5   :  { %225 = vmatmul.msk.f32.vlgmr.msra.gmra.mxu0 %vm57_vm0, %v29_v2  ;;  %v30_v8 = vld [vmem:[%s388_s1 + $0x8] sm:$0xff]  ;;  %v110_v9 = vld [vmem:[%s391_s4] sm:$0xff]  ;;  %v31_v11 = vld [vmem:[%s388_s1 + $0x10] sm:$0xff]  ;;  %s213_s11 = sshll.u32 %s275_s10, 4  ;;  %s215_s14 = sshll.u32 %s394_s7, 4  ;;  %vm206_vm2 = vcmask 57344   ;;  %s214_s11 = int_to_ptr.vmem [resolvable:$true] %s213_s11  ;;  %s216_s14 = int_to_ptr.hbm [resolvable:$true] %s215_s14 }
   0x6   :  { %228 = vmatmul.msk.f32.vlgmr.msra.gmra.mxu1 %vm57_vm0, %v32_v5  ;;  %v111_v10 = vld [vmem:[%s391_s4 + $0x8] sm:$0xff]  ;;  %v113_v16 = vld [vmem:[%s391_s4 + $0x18] sm:$0xff]  ;;  %v112_v20 = vld [vmem:[%s391_s4 + $0x10] sm:$0xff] }
   0x7   :  { %131 = vperm.xlu2 %247, %v113_v16   ;;  %v106_v30 = vld [vmem:[%s390_s3] sm:$0xff]  ;;  %v107_v31 = vld [vmem:[%s390_s3 + $0x8] sm:$0xff]  ;;  %v108_v32 = vld [vmem:[%s390_s3 + $0x10] sm:$0xff] }
   0x8   :  { %v109_v33 = vld [vmem:[%s390_s3 + $0x18] sm:$0xff]  ;;  %v180_v50 = vld [vmem:[%s392_s5] sm:$0x1] }
   0xa   :  { %39 = vperm.xlu1 %246, %v33_v6  }
   0xb   :  { %49 = vperm.xlu0 %245, %v35_v7  }
   0xd   :  { %226 = vmatmul.msk.f32.gmra.mxu0 %vm57_vm0, %v30_v8 }
   0xf   :  { %126 = vperm.xlu2 %247, %v112_v20  }
  0x12   :  { %116 = vperm.xlu1 %246, %v110_v9  }
  0x13   :  { %121 = vperm.xlu0 %245, %v111_v10  }
  0x15   :  { %227 = vmatmul.msk.f32.gmra.mxu0 %vm57_vm0, %v31_v11 }
  0x61   :  { %v132_v34 = vpop.permute.xlu2 %131 }
  0x69   :  { %v127_v36 = vpop.permute.xlu2 %126 }
  0x74   :  { %v45_v17 = vpop.permute.xlu1 %44 }
  0x75   :  { %v55_v13 = vpop.permute.xlu0 %54 }
  0x7c   :  { %v40_v21 = vpop.permute.xlu1 %39 }
  0x7d   :  { %v50_v22 = vpop.permute.xlu0 %49 }
  0x82   :  { %v90_v12 = vpop.f32.mrf.mxu0 }
  0x83   :  { %v99_v14 = vpop.f32.mrf.mxu1  ;;  %v91_v26 = vadd.f32 %v90_v12, %v40_v21 }
  0x84   :  { %v100_v15 = vadd.f32 %v99_v14, %v55_v13  ;;  %v117_v45 = vpop.permute.xlu1 %116 }
  0x85   :  { %v102_v29 = vmax.f32 %v91_v26, 0.0  ;;  %v122_v41 = vpop.permute.xlu0 %121 }
  0x86   :  { %v105_v18 = vmax.f32 %v100_v15, 0.0 }
  0x88   :  { %159 = vmatpush.msrb.mxu1 %v105_v18  ;;  %235 = vmatpush.msra.mxu2 %v105_v18 }
  0x89   :  { %236 = vmatpush.msra.mxu3 %v105_v18 }
  0x8a   :  { %v93_v19 = vpop.f32.mrf.mxu0 }
  0x8b   :  { %v94_v24 = vadd.f32 %v93_v19, %v45_v17 }
  0x8d   :  { %v103_v28 = vmax.f32 %v94_v24, 0.0 }
  0x92   :  { %v96_v23 = vpop.f32.mrf.mxu0 }
  0x93   :  { %v97_v25 = vadd.f32 %v96_v23, %v50_v22 }
  0x95   :  { %v104_v27 = vmax.f32 %v97_v25, 0.0 }
  0x97   :  { %160 = vmatpush.msrb.mxu1 %v104_v27  ;;  %237 = vmatpush.msra.mxu2 %v104_v27 }
  0x98   :  { %238 = vmatpush.msra.mxu3 %v104_v27 }
  0x99   :  { %161 = vmatpush.msrb.mxu1 %v103_v28  ;;  %239 = vmatpush.msra.mxu2 %v103_v28 }
  0x9a   :  { %240 = vmatpush.msra.mxu3 %v103_v28 }
  0x9b   :  { %162 = vmatpush.msrb.mxu1 %v102_v29  ;;  %241 = vmatpush.msra.mxu2 %v102_v29 }
  0x9c   :  { %242 = vmatpush.msra.mxu3 %v102_v29  ;;  %229 = vmatmul.msk.f32.vlgmr.msrb.gmra.mxu1 %vm134_vm1, %v106_v30 }
  0x9d   :  { %230 = vmatmul.msk.f32.vlgmr.msra.gmra.mxu2 %vm134_vm1, %v107_v31  ;;  %231 = vmatmul.msk.f32.vlgmr.msra.gmra.mxu3 %vm134_vm1, %v108_v32 }
  0xa5   :  { %232 = vmatmul.msk.f32.gmra.mxu3 %vm134_vm1, %v109_v33 }
 0x119   :  { %v164_v42 = vpop.f32.mrf.mxu1 }
 0x11a   :  { %v165_v46 = vadd.f32 %v164_v42, %v117_v45 }
 0x11c   :  { %v176_v49 = vmax.f32 %v165_v46, 0.0 }
 0x120   :  { %v170_v35 = vpop.f32.mrf.mxu3  ;;  %v167_v37 = vpop.f32.mrf.mxu2 }
 0x121   :  { %v171_v39 = vadd.f32 %v170_v35, %v127_v36  ;;  %v168_v43 = vadd.f32 %v167_v37, %v122_v41 }
 0x123   :  { %v178_v47 = vmax.f32 %v171_v39, 0.0  ;;  %v177_v48 = vmax.f32 %v168_v43, 0.0 }
 0x128   :  { %v173_v38 = vpop.f32.mrf.mxu3 }
 0x129   :  { %v174_v40 = vadd.f32 %v173_v38, %v132_v34 }
 0x12b   :  { %v179_v44 = vmax.f32 %v174_v40, 0.0 }
 0x12d   :  { %198 = vmatpush.msrb.mxu2 %v179_v44 }
 0x12f   :  { %199 = vmatpush.msrb.mxu2 %v178_v47 }
 0x131   :  { %200 = vmatpush.msrb.mxu2 %v177_v48 }
 0x133   :  { %201 = vmatpush.msrb.mxu2 %v176_v49 }
 0x134   :  { %233 = vmatmul.msk.f32.vlgmr.msrb.gmra.mxu2 %vm134_vm1, %v180_v50 }
 0x1b7   :  { %v203_v52 = vpop.f32.mrf.mxu2 }
 0x1b8   :  { %v204_v53 = vadd.f32 %v203_v52, %v182_v51 }
 0x1ba   :  { %207 = vst.msk [vmem:[#allocation3] sm:$0x1] %vm206_vm2, %v204_v53 }
 0x1bb   :  { %218 = dma.vmem_to_hbm [thread:$0]  %s214_s11, 16, %s216_s14, [#allocation4]  }
 0x1bc   :  { %272 = dma.done.wait [#allocation4], 16  }
 0x1bd   :  { %273 = vsyncadd [#allocation4], 4294967280 }
 0x1be   :  { %223 = vsyncpa [#allocation4], 1 }

</bundles_post_ra>
